<compile_context>
chip_gen: v5e
topology: v5e:2x2
jax: 0.10.0
libtpu: 0.0.40
codegen_flags: <defaults>
</compile_context>

<pallas_src>
import functools

import jax
import jax.numpy as jnp
from jax import lax
from jax.experimental import pallas as pl
from jax.experimental.pallas import tpu as pltpu


def _round_up(x, m):
    return (x + m - 1) // m * m


def _vq_kernel(with_distance, z_ref, cb_ref, cbsq_ref, idx_ref, *dist_refs):
    # z_ref: (tile_n, D)   cb_ref: (K_pad, D)   cbsq_ref: (1, K_pad)
    z = z_ref[...].astype(jnp.float32)
    cb = cb_ref[...].astype(jnp.float32)
    k_pad = cb.shape[0]

    z_sq = jnp.sum(z * z, axis=-1, keepdims=True)                    # (tile_n, 1)
    # z @ cb^T on the MXU without materializing a transposed codebook.
    dots = lax.dot_general(z, cb, (((1,), (1,)), ((), ())),
                           preferred_element_type=jnp.float32)       # (tile_n, K_pad)
    # Padded codebook columns carry ||E||^2 = +1e30, so neg_dist there is
    # ~-1e30 and can never win the argmax -> no mask pass needed.
    neg_dist = 2.0 * dots - z_sq - cbsq_ref[...]                      # (tile_n, K_pad)

    # argmax over the codebook axis, first-match tie-break (== torch.argmax).
    # TODO(synk): lax.argmax_p has no Mosaic lowering; keep the manual
    #             max + iota/select + min formulation.
    col = lax.broadcasted_iota(jnp.int32, neg_dist.shape, 1)
    max_val = jnp.max(neg_dist, axis=-1, keepdims=True)
    idx = jnp.min(jnp.where(neg_dist == max_val, col, k_pad), axis=-1)

    idx_ref[...] = idx[None, :].astype(jnp.int32)                     # lane-dense row
    if with_distance:
        dist_refs[0][...] = neg_dist.astype(dist_refs[0].dtype)


def _choose_tile_n(n, k_pad, sublane):
    # The kernel keeps ~2 live (tile_n, K_pad) f32 temporaries plus a
    # double-buffered (tile_n, K_pad) distance output block (~4 copies).
    # Keep each copy <= ~3 MiB so the total stays well inside v7x's 64 MiB
    # VMEM (and far inside v5e/v6e's 128 MiB).
    cap = max(128, ((3 * 1024 * 1024) // (k_pad * 4)) // 128 * 128)
    tile = min(512, cap)
    if n <= tile:
        tile = _round_up(max(n, 1), sublane)
    return tile


def _vmem_capacity_bytes():
    try:
        return int(pltpu.get_tpu_info().vmem_capacity_bytes)
    except Exception:
        return 64 * 2**20   # conservative: v7x per-TensorCore VMEM


def vq_forward(z, codebook, *, commitment_weight=1.0, tile_n=None,
               return_distance=True):
    """z: (B, T, D); codebook: (K, D).  Inputs kept in their native dtype."""
    B, T, D = z.shape
    K, D2 = codebook.shape
    assert D == D2, "codebook_dim mismatch"
    N = B * T

    K_pad = _round_up(K, 128)
    z_item = jnp.dtype(z.dtype).itemsize
    cb_item = jnp.dtype(codebook.dtype).itemsize
    sublane = {4: 8, 2: 16, 1: 32}.get(z_item, 8)
    if tile_n is None:
        tile_n = _choose_tile_n(N, K_pad, sublane)
    N_pad = _round_up(N, tile_n)
    num_tiles = N_pad // tile_n

    zf = z.reshape(N, D)
    if N_pad != N:
        zf = jnp.pad(zf, ((0, N_pad - N), (0, 0)))
    cb = codebook
    if K_pad != K:
        cb = jnp.pad(cb, ((0, K_pad - K), (0, 0)))

    # ||E||^2 hoisted out of the kernel (grid-invariant).  Padded columns get
    # a huge value so they never win the argmax.
    cb_sq = jnp.sum(codebook.astype(jnp.float32) ** 2, axis=-1)[None, :]
    if K_pad != K:
        cb_sq = jnp.pad(cb_sq, ((0, 0), (0, K_pad - K)), constant_values=1e30)

    # --- specs ---------------------------------------------------------------
    cb_spec = pl.BlockSpec((K_pad, D), lambda i: (0, 0))
    if K_pad * D * cb_item > (4 << 20):
        # Large codebooks: single-buffer the grid-invariant operand to save
        # one full copy of it in VMEM (it is only DMA'd once anyway).
        cb_spec = pl.BlockSpec((K_pad, D), lambda i: (0, 0),
                               pipeline_mode=pl.Buffered(1))

    in_specs = [
        pl.BlockSpec((tile_n, D), lambda i: (i, 0)),
        cb_spec,
        pl.BlockSpec((1, K_pad), lambda i: (0, 0)),
    ]

    out_shapes = [jax.ShapeDtypeStruct((1, N_pad), jnp.int32)]
    out_specs = [pl.BlockSpec((1, tile_n), lambda i: (0, i))]
    if return_distance:
        out_shapes.append(jax.ShapeDtypeStruct((N_pad, K_pad), jnp.float32))
        out_specs.append(pl.BlockSpec((tile_n, K_pad), lambda i: (i, 0)))

    # --- VMEM budget (includes in-kernel temporaries) --------------------------
    dist_out_bufs = 2 if return_distance else 0
    est = (2 * tile_n * D * z_item                     # z blocks (double-buffered)
           + 2 * K_pad * D * cb_item                   # codebook (worst case 2 bufs)
           + 2 * K_pad * 4                             # ||E||^2 row
           + (2 + dist_out_bufs) * tile_n * K_pad * 4  # dots/neg_dist + dist out
           + tile_n * D * 4                            # f32 upcast of z
           + 4 * tile_n * 4)                           # idx out blocks
    vmem_cap = _vmem_capacity_bytes()
    vmem_limit = int(min(vmem_cap - (16 << 20), max(32 << 20, 2 * est)))

    cost = pl.CostEstimate(
        flops=2 * N_pad * K_pad * D,                   # distance matmul
        transcendentals=0,
        bytes_accessed=(N_pad * D * z_item + K_pad * D * cb_item + K_pad * 4
                        + N_pad * 4
                        + (N_pad * K_pad * 4 if return_distance else 0)),
    )

    outs = pl.pallas_call(
        functools.partial(_vq_kernel, return_distance),
        out_shape=tuple(out_shapes),
        grid_spec=pltpu.PrefetchScalarGridSpec(
            num_scalar_prefetch=0,
            grid=(num_tiles,),
            in_specs=in_specs,
            out_specs=tuple(out_specs),
        ),
        compiler_params=pltpu.CompilerParams(
            dimension_semantics=("parallel",),
            vmem_limit_bytes=vmem_limit),
        cost_estimate=cost,
    )(zf, cb, cb_sq)

    if return_distance:
        idx2d, dist = outs
    else:
        (idx2d,) = outs

    indices_flat = idx2d[0, :N]
    indices = indices_flat.reshape(B, T)

    # Codebook gather + commitment loss in plain XLA: ~N*D extra HBM bytes,
    # negligible vs the N*K distance traffic, and it removes a second
    # K_pad-contraction matmul + two full-tile VPU passes from the kernel.
    zf_real = z.reshape(N, D).astype(jnp.float32)
    zq_flat = jnp.take(codebook.astype(jnp.float32), indices_flat, axis=0)
    zq = zq_flat.reshape(B, T, D)
    vqloss = commitment_weight * jnp.mean((zq_flat - zf_real) ** 2)

    if return_distance:
        distance = dist[:N, :K].reshape(B, T, K)
        return zq, indices, vqloss, distance
    return zq, indices, vqloss, None


class CNN1DQuantizerQE:
    """JAX/Pallas equivalent of CNN_1D_quantizer_QE (inference forward path).

    heads(codebook_num)=1, use_cosine_sim=False, orthogonal_reg_weight=0,
    stochastic=False; `update` has no effect at inference time.
    """

    def __init__(self, codebook_size, codebook_dim, key):
        # deterministic synthetic codebook (stands in for kmeans/EMA-trained one)
        self.codebook = jax.random.normal(
            key, (codebook_size, codebook_dim), dtype=jnp.float32)

    def __call__(self, z, stochastic=False, update=True, indices=None):
        # TODO(synk): stochastic gumbel sampling, EMA codebook update, and the
        #             `indices is not None` cross-entropy branch are training-time
        #             paths and are not implemented here (inference path only).
        return vq_forward(z, self.codebook)


if __name__ == "__main__":
    key = jax.random.PRNGKey(0)
    k_cb, k_z = jax.random.split(key)

    B, T, D, K = 2, 8, 32, 64          # batch, seq, codebook_dim, codebook_size
    quantizer = CNN1DQuantizerQE(codebook_size=K, codebook_dim=D, key=k_cb)
    z = jax.random.normal(k_z, (B, T, D), dtype=jnp.float32)

    zq, indices, vqloss, distance = quantizer(z, stochastic=False, update=False)
    jax.block_until_ready((zq, indices, vqloss, distance))

    # lightweight pure-JAX reference check
    cb = quantizer.codebook
    zf = z.reshape(-1, D)
    ref_dist = -(jnp.sum(zf**2, -1, keepdims=True) - 2 * zf @ cb.T
                 + jnp.sum(cb**2, -1)[None, :])
    ref_idx = jnp.argmax(ref_dist, -1)
    ref_zq = cb[ref_idx]
    ref_loss = jnp.mean((ref_zq - zf) ** 2)
    assert jnp.array_equal(indices.reshape(-1), ref_idx.astype(jnp.int32))
    assert jnp.allclose(zq.reshape(-1, D), ref_zq, atol=1e-5, rtol=1e-5)
    assert jnp.allclose(distance.reshape(-1, K), ref_dist, atol=1e-4, rtol=1e-5)
    assert jnp.allclose(vqloss, ref_loss, atol=1e-5, rtol=1e-5)

    print("KERNEL_OK")
</pallas_src>

<mosaic_0001>
module attributes {stable_mosaic.version = 11 : i64} {
  func.func @_vq_kernel(%arg0: i32, %arg1: memref<16x32xf32, #tpu.memory_space<vmem>>, %arg2: memref<128x32xf32, #tpu.memory_space<vmem>>, %arg3: memref<1x128xf32, #tpu.memory_space<vmem>>, %arg4: memref<1x16xi32, #tpu.memory_space<vmem>>, %arg5: memref<16x128xf32, #tpu.memory_space<vmem>>) attributes {dimension_semantics = [#tpu.dimension_semantics<parallel>], iteration_bounds = array<i64: 1>, scalar_prefetch = 0 : i64, scratch_operands = 0 : i64, tpu.core_type = #tpu.core_type<tc>, window_params = [{transform_indices = @transform_0, window_bounds = array<i64: 16, 32>}, {pipeline_mode = #tpu.pipeline_mode<synchronous>, transform_indices = @transform_1, window_bounds = array<i64: 128, 32>}, {pipeline_mode = #tpu.pipeline_mode<synchronous>, transform_indices = @transform_2, window_bounds = array<i64: 1, 128>}, {transform_indices = @transform_3, window_bounds = array<i64: 1, 16>}, {transform_indices = @transform_4, window_bounds = array<i64: 16, 128>}]} {
    %c0 = arith.constant 0 : index
    %c0_0 = arith.constant 0 : index
    %0 = vector.load %arg1[%c0, %c0_0] : memref<16x32xf32, #tpu.memory_space<vmem>>, vector<16x32xf32>
    %c0_1 = arith.constant 0 : index
    %c0_2 = arith.constant 0 : index
    %1 = vector.load %arg2[%c0_1, %c0_2] : memref<128x32xf32, #tpu.memory_space<vmem>>, vector<128x32xf32>
    %2 = arith.mulf %0, %0 : vector<16x32xf32>
    %cst = arith.constant dense<0.000000e+00> : vector<16xf32>
    %3 = vector.multi_reduction <add>, %2, %cst [1] : vector<16x32xf32> to vector<16xf32>
    %4 = vector.shape_cast %3 : vector<16xf32> to vector<16x1xf32>
    %cst_3 = arith.constant dense<0.000000e+00> : vector<16x128xf32>
    %5 = tpu.matmul %0, %1, %cst_3 {dimension_numbers = #tpu.dot_dimension_numbers<[1], [1], [0], [0], [0, 0, 1, 0], [], []>} : vector<16x32xf32>, vector<128x32xf32>, vector<16x128xf32> -> vector<16x128xf32>
    %cst_4 = arith.constant 2.000000e+00 : f32
    %6 = vector.broadcast %cst_4 : f32 to vector<16x128xf32>
    %7 = arith.mulf %6, %5 : vector<16x128xf32>
    %8 = vector.broadcast %4 : vector<16x1xf32> to vector<16x128xf32>
    %9 = arith.subf %7, %8 : vector<16x128xf32>
    %c0_5 = arith.constant 0 : index
    %c0_6 = arith.constant 0 : index
    %10 = vector.load %arg3[%c0_5, %c0_6] : memref<1x128xf32, #tpu.memory_space<vmem>>, vector<1x128xf32>
    %11 = vector.broadcast %10 : vector<1x128xf32> to vector<16x128xf32>
    %12 = arith.subf %9, %11 : vector<16x128xf32>
    %13 = tpu.iota {dimensions = array<i32: 1>} : vector<16x128xi32>
    %cst_7 = arith.constant dense<0xFF800000> : vector<16xf32>
    %14 = vector.multi_reduction <maximumf>, %12, %cst_7 [1] : vector<16x128xf32> to vector<16xf32>
    %15 = vector.shape_cast %14 : vector<16xf32> to vector<16x1xf32>
    %16 = vector.broadcast %15 : vector<16x1xf32> to vector<16x128xf32>
    %17 = arith.cmpf oeq, %12, %16 : vector<16x128xf32>
    %c128_i32 = arith.constant 128 : i32
    %18 = vector.broadcast %c128_i32 : i32 to vector<16x128xi32>
    %19 = arith.select %17, %13, %18 : vector<16x128xi1>, vector<16x128xi32>
    %cst_8 = arith.constant dense<2147483647> : vector<16xi32>
    %20 = vector.multi_reduction <minsi>, %19, %cst_8 [1] : vector<16x128xi32> to vector<16xi32>
    %21 = vector.shape_cast %20 : vector<16xi32> to vector<1x16xi32>
    %c0_9 = arith.constant 0 : index
    %c0_10 = arith.constant 0 : index
    %22 = vector.load %arg4[%c0_9, %c0_10] : memref<1x16xi32, #tpu.memory_space<vmem>>, vector<1x16xi32>
    tpu.vector_store %arg4[%c0_9, %c0_10], %21 {strides = array<i32>} : memref<1x16xi32, #tpu.memory_space<vmem>>, vector<1x16xi32>,
    %c0_11 = arith.constant 0 : index
    %c0_12 = arith.constant 0 : index
    %23 = vector.load %arg5[%c0_11, %c0_12] : memref<16x128xf32, #tpu.memory_space<vmem>>, vector<16x128xf32>
    tpu.vector_store %arg5[%c0_11, %c0_12], %12 {strides = array<i32>} : memref<16x128xf32, #tpu.memory_space<vmem>>, vector<16x128xf32>,
    return
  }
  func.func @transform_0(%arg0: i32) -> (i32, i32) {
    %c0_i32 = arith.constant 0 : i32
    %c0_i32_0 = arith.constant 0 : i32
    return %arg0, %c0_i32 : i32, i32
  }
  func.func @transform_1(%arg0: i32) -> (i32, i32) {
    %c0_i32 = arith.constant 0 : i32
    %c0_i32_0 = arith.constant 0 : i32
    %c0_i32_1 = arith.constant 0 : i32
    return %c0_i32, %c0_i32_0 : i32, i32
  }
  func.func @transform_2(%arg0: i32) -> (i32, i32) {
    %c0_i32 = arith.constant 0 : i32
    %c0_i32_0 = arith.constant 0 : i32
    %c0_i32_1 = arith.constant 0 : i32
    return %c0_i32, %c0_i32_0 : i32, i32
  }
  func.func @transform_3(%arg0: i32) -> (i32, i32) {
    %c0_i32 = arith.constant 0 : i32
    %c0_i32_0 = arith.constant 0 : i32
    return %c0_i32, %arg0 : i32, i32
  }
  func.func @transform_4(%arg0: i32) -> (i32, i32) {
    %c0_i32 = arith.constant 0 : i32
    %c0_i32_0 = arith.constant 0 : i32
    return %arg0, %c0_i32 : i32, i32
  }
}

</mosaic_0001>

<bundles_post_ra>
// kernel: tpu_custom_call.1
= control target key start
LH: loop header
LB: loop body
LE: loop exit
PB: predicated region body
PF: predicated region fallthrough
CT: control target
= control target key end

     0   :  { %10 = vsyncpa [#allocation3], 0  ;;  %vm38_vm0 = vcmask 261120   ;;  %s432_s0 = inlined_call_operand.vmem [shape: f32[16,32], index: 0, kind: input, shape index: {}]   ;;  %s433_s1 = inlined_call_operand.vmem [shape: f32[128,32], index: 1, kind: input, shape index: {}]   ;;  %s434_s2 = inlined_call_operand.vmem [shape: f32[1,128], index: 2, kind: input, shape index: {}]   ;;  %s435_s3 = inlined_call_operand.hbm [shape: s32[1,16], index: 3, kind: output, shape index: {0}]   ;;  %s436_s4 = inlined_call_operand.hbm [shape: f32[16,128], index: 4, kind: output, shape index: {1}]  }
   0x1   :  { %v35_v0 = vld [vmem:[%s433_s1 + $0x78] sm:$0xff]  ;;  %v34_v1 = vld [vmem:[%s433_s1 + $0x70] sm:$0xff] }
   0x2   :  { %213 = vmatpush.xpose.msk.msra.mxu0 %vm38_vm0, %v35_v0  ;;  %231 = vmatpush.xpose.msk.msra.mxu1 %vm38_vm0, %v35_v0 }
   0x3   :  { %11 = vsyncpa [#allocation5], 0  ;;  %v33_v2 = vld [vmem:[%s433_s1 + $0x68] sm:$0xff]  ;;  %v32_v3 = vld [vmem:[%s433_s1 + $0x60] sm:$0xff]  ;;  %v132_v33 = vlaneseq  ;;  %s196_s28 = sshll.u32 %s436_s4, 4  ;;  %s305_s29 = smov 128   ;;  %s197_s28 = int_to_ptr.hbm [resolvable:$true] %s196_s28 }
   0x4   :  { %v31_v4 = vld [vmem:[%s433_s1 + $0x58] sm:$0xff]  ;;  %v30_v5 = vld [vmem:[%s433_s1 + $0x50] sm:$0xff]  ;;  %v29_v6 = vld [vmem:[%s433_s1 + $0x48] sm:$0xff]  ;;  %s306_s30 = smov 8   ;;  %s307_s4 = smov [#allocation2]   ;;  %vm173_vm5 = vcmask 130112  }
   0x5   :  { %v28_v7 = vld [vmem:[%s433_s1 + $0x40] sm:$0xff]  ;;  %v27_v8 = vld [vmem:[%s433_s1 + $0x38] sm:$0xff]  ;;  %v26_v11 = vld [vmem:[%s433_s1 + $0x30] sm:$0xff]  ;;  %v133_v34 = vand.u32 127, %v132_v33  ;;  %s184_s5 = sshll.u32 %s307_s4, 4  ;;  %s186_s8 = sshll.u32 %s435_s3, 4  ;;  %s185_s5 = int_to_ptr.vmem [resolvable:$true] %s184_s5  ;;  %s187_s8 = int_to_ptr.hbm [resolvable:$true] %s186_s8 }
   0x6   :  { %214 = vmatpush.xpose.msk.msra.mxu0 %vm38_vm0, %v34_v1  ;;  %232 = vmatpush.xpose.msk.msra.mxu1 %vm38_vm0, %v34_v1  ;;  %v18_v9 = vld [vmem:[%s432_s0] sm:$0xff]  ;;  %v19_v13 = vld [vmem:[%s432_s0 + $0x8] sm:$0xff]  ;;  %v23_v18 = vld [vmem:[%s433_s1 + $0x18] sm:$0xff]  ;;  %vm175_vm6 = vcmask 122880  }
   0x7   :  { %v36_v10 = vmul.f32 %v18_v9, %v18_v9  ;;  %v37_v14 = vmul.f32 %v19_v13, %v19_v13  ;;  %v25_v15 = vld [vmem:[%s433_s1 + $0x28] sm:$0xff]  ;;  %v24_v17 = vld [vmem:[%s433_s1 + $0x20] sm:$0xff]  ;;  %v22_v19 = vld [vmem:[%s433_s1 + $0x10] sm:$0xff]  ;;  %v171_v59 = vadd.s32 4294967288, %v133_v34 }
   0x8   :  { %v21_v20 = vld [vmem:[%s433_s1 + $0x8] sm:$0xff]  ;;  %v20_v21 = vld [vmem:[%s433_s1] sm:$0xff]  ;;  %s304_s1 = smov [#allocation4]  }
   0x9   :  { %v39_v12 = vsel %vm38_vm0, %v36_v10, 0.0  ;;  %v42_v16 = vsel %vm38_vm0, %v37_v14, 0.0  ;;  %v251_v27 = vld [vmem:[%s434_s2] ss:$0 sm:$0xff]  ;;  %s194_s2 = sshll.u32 %s304_s1, 4  ;;  %s195_s2 = int_to_ptr.vmem [resolvable:$true] %s194_s2 }
   0xa   :  { %215 = vmatpush.xpose.msk.msra.mxu0 %vm38_vm0, %v33_v2  ;;  %233 = vmatpush.xpose.msk.msra.mxu1 %vm38_vm0, %v33_v2 }
   0xb   :  { %40 = vadd.xlane.f32.xlu0 %v39_v12 }
   0xe   :  { %216 = vmatpush.xpose.msk.msra.mxu0 %vm38_vm0, %v32_v3  ;;  %234 = vmatpush.xpose.msk.msra.mxu1 %vm38_vm0, %v32_v3 }
  0x12   :  { %217 = vmatpush.xpose.msk.msra.mxu0 %vm38_vm0, %v31_v4  ;;  %235 = vmatpush.xpose.msk.msra.mxu1 %vm38_vm0, %v31_v4 }
  0x13   :  { %43 = vadd.xlane.f32.xlu0 %v42_v16 }
  0x16   :  { %218 = vmatpush.xpose.msk.msra.mxu0 %vm38_vm0, %v30_v5  ;;  %236 = vmatpush.xpose.msk.msra.mxu1 %vm38_vm0, %v30_v5 }
  0x1a   :  { %219 = vmatpush.xpose.msk.msra.mxu0 %vm38_vm0, %v29_v6  ;;  %237 = vmatpush.xpose.msk.msra.mxu1 %vm38_vm0, %v29_v6 }
  0x1e   :  { %220 = vmatpush.xpose.msk.msra.mxu0 %vm38_vm0, %v28_v7  ;;  %238 = vmatpush.xpose.msk.msra.mxu1 %vm38_vm0, %v28_v7 }
  0x22   :  { %221 = vmatpush.xpose.msk.msra.mxu0 %vm38_vm0, %v27_v8  ;;  %239 = vmatpush.xpose.msk.msra.mxu1 %vm38_vm0, %v27_v8 }
  0x26   :  { %222 = vmatpush.xpose.msk.msra.mxu0 %vm38_vm0, %v26_v11  ;;  %240 = vmatpush.xpose.msk.msra.mxu1 %vm38_vm0, %v26_v11 }
  0x2a   :  { %223 = vmatpush.xpose.msk.msra.mxu0 %vm38_vm0, %v25_v15  ;;  %241 = vmatpush.xpose.msk.msra.mxu1 %vm38_vm0, %v25_v15 }
  0x2e   :  { %224 = vmatpush.xpose.msk.msra.mxu0 %vm38_vm0, %v24_v17  ;;  %242 = vmatpush.xpose.msk.msra.mxu1 %vm38_vm0, %v24_v17 }
  0x32   :  { %225 = vmatpush.xpose.msk.msra.mxu0 %vm38_vm0, %v23_v18  ;;  %243 = vmatpush.xpose.msk.msra.mxu1 %vm38_vm0, %v23_v18 }
  0x36   :  { %226 = vmatpush.xpose.msk.msra.mxu0 %vm38_vm0, %v22_v19  ;;  %244 = vmatpush.xpose.msk.msra.mxu1 %vm38_vm0, %v22_v19 }
  0x3a   :  { %227 = vmatpush.xpose.msk.msra.mxu0 %vm38_vm0, %v21_v20  ;;  %245 = vmatpush.xpose.msk.msra.mxu1 %vm38_vm0, %v21_v20 }
  0x3e   :  { %228 = vmatpush.xpose.msk.msra.mxu0 %vm38_vm0, %v20_v21  ;;  %246 = vmatpush.xpose.msk.msra.mxu1 %vm38_vm0, %v20_v21 }
  0x41   :  { %229 = vmatmul.msk.f32.vlgmr.msra.gmra.mxu0 %vm38_vm0, %v18_v9  ;;  %230 = vmatmul.msk.f32.vlgmr.msra.gmra.mxu1 %vm38_vm0, %v19_v13 }
  0x7e   :  { %v41_v22 = vpop.xlane.xlu0 %40 }
  0x86   :  { %v44_v23 = vpop.xlane.xlu0 %43 }
  0xbe   :  { %v116_v24 = vpop.f32.mrf.mxu0  ;;  %v119_v25 = vpop.f32.mrf.mxu1 }
  0xbf   :  { %v122_v26 = vmul.f32 2.0, %v116_v24  ;;  %v123_v28 = vmul.f32 2.0, %v119_v25 }
  0xc1   :  { %v124_v29 = vsub.f32 %v122_v26, %v41_v22  ;;  %v125_v30 = vsub.f32 %v123_v28, %v44_v23 }
  0xc3   :  { %v130_v31 = vsub.f32 %v124_v29, %v251_v27  ;;  %v131_v32 = vsub.f32 %v125_v30, %v251_v27 }
  0xc5   :  { %177 = vst [vmem:[#allocation4] sm:$0xff] %v130_v31  ;;  %134 = vmax.xlane.f32.xlu1 %v130_v31 }
  0xc6   :  { %178 = vst [vmem:[#allocation4 + $0x8] sm:$0xff] %v131_v32 }
  0xc7   :  { %202 = dma.vmem_to_hbm [thread:$0]  %s195_s2, 256, %s197_s28, [#allocation5], %s305_s29, %s305_s29, %s306_s30  }
  0xcd   :  { %136 = vmax.xlane.f32.xlu1 %v131_v32 }
 0x138   :  { %v135_v35 = vpop.xlane.xlu1 %134 }
 0x139   :  { %vm138_vm1 = vcmp.eq.f32.partialorder %v130_v31, %v135_v35 }
 0x13a   :  { %v140_v36 = vsel %vm138_vm1, %v133_v34, 128 }
 0x13b   :  { %v143_v37 = vshra.s32 %v140_v36, 16  ;;  %v142_v43 = vand.u32 65535, %v140_v36 }
 0x13d   :  { %v145_v38 = vcvt.s32.f32 %v143_v37  ;;  %v144_v45 = vcvt.s32.f32 %v142_v43 }
 0x13f   :  { %146 = vmin.xlane.f32.xlu2 %v145_v38 }
 0x140   :  { %v137_v39 = vpop.xlane.xlu1 %136 }
 0x141   :  { %vm139_vm2 = vcmp.eq.f32.partialorder %v131_v32, %v137_v39 }
 0x142   :  { %v141_v40 = vsel %vm139_vm2, %v133_v34, 128 }
 0x143   :  { %v157_v41 = vshra.s32 %v141_v40, 16  ;;  %v156_v47 = vand.u32 65535, %v141_v40 }
 0x145   :  { %v159_v42 = vcvt.s32.f32 %v157_v41  ;;  %v158_v49 = vcvt.s32.f32 %v156_v47 }
 0x147   :  { %160 = vmin.xlane.f32.xlu2 %v159_v42 }
 0x1b2   :  { %v147_v44 = vpop.xlane.xlu2 %146 }
 0x1b3   :  { %vm148_vm3 = vcmp.eq.f32.partialorder %v145_v38, %v147_v44  ;;  %v153_v52 = vcvt.f32.s32 %v147_v44 }
 0x1b4   :  { %v149_v46 = vsel %vm148_vm3, %v144_v45, inf }
 0x1b5   :  { %150 = vmin.xlane.f32.xlu0 %v149_v46  ;;  %v154_v55 = vshll.u32 %v153_v52, 16 }
 0x1ba   :  { %v161_v48 = vpop.xlane.xlu2 %160 }
 0x1bb   :  { %vm162_vm4 = vcmp.eq.f32.partialorder %v159_v42, %v161_v48  ;;  %v167_v53 = vcvt.f32.s32 %v161_v48 }
 0x1bc   :  { %v163_v50 = vsel %vm162_vm4, %v158_v49, inf }
 0x1bd   :  { %164 = vmin.xlane.f32.xlu1 %v163_v50  ;;  %v168_v57 = vshll.u32 %v167_v53, 16 }
 0x228   :  { %v151_v51 = vpop.xlane.xlu0 %150 }
 0x229   :  { %v152_v54 = vcvt.f32.s32 %v151_v51 }
 0x22b   :  { %v155_v58 = vadd.s32 %v154_v55, %v152_v54 }
 0x22d   :  { %v170_v62 = vperm.slane %v155_v58, %v133_v34 }
 0x230   :  { %v165_v56 = vpop.xlane.xlu1 %164 }
 0x231   :  { %v166_v60 = vcvt.f32.s32 %v165_v56 }
 0x233   :  { %v169_v61 = vadd.s32 %v168_v57, %v166_v60 }
 0x235   :  { %v172_v63 = vperm.slane %v169_v61, %v171_v59 }
 0x237   :  { %v174_v0 = vsel %vm173_vm5, %v172_v63, %v170_v62 }
 0x238   :  { %176 = vst.msk [vmem:[#allocation2] sm:$0x1] %vm175_vm6, %v174_v0 }
 0x239   :  { %189 = dma.vmem_to_hbm [thread:$0]  %s185_s5, 16, %s187_s8, [#allocation3]  }
 0x23a   :  { %300 = dma.done.wait [#allocation3], 16  }
 0x23b   :  { %301 = vsyncadd [#allocation3], 4294967280 }
 0x23c   :  { %302 = dma.done.wait [#allocation5], 256  }
 0x23d   :  { %303 = vsyncadd [#allocation5], 4294967040 }
 0x23e   :  { %211 = vsyncpa [#allocation3], 1 }
 0x23f   :  { %212 = vsyncpa [#allocation5], 1 }

</bundles_post_ra>
